<compile_context>
chip_gen: v7x
topology: tpu7x:2x2x1
jax: 0.10.0
libtpu: 0.0.40
codegen_flags: <defaults>
</compile_context>

<pallas_src>
import math

import jax
import jax.numpy as jnp
from jax.experimental import pallas as pl
from jax.experimental.pallas import tpu as pltpu


def _round_up(n, m):
    return ((n + m - 1) // m) * m


def _cdiv(a, b):
    return (a + b - 1) // b


def decoder_kernel(x_ref, w1_ref, b1_ref, w2_ref, b2_ref, w3_ref, b3_ref, o_ref):
    # One packed batch tile per grid step; block-diagonal weights are VMEM-resident.
    h = jnp.dot(x_ref[...], w1_ref[...], preferred_element_type=jnp.float32) + b1_ref[...]
    h = jnp.maximum(h, 0.0)                                    # ReLU (VPU)
    h = jnp.dot(h, w2_ref[...], preferred_element_type=jnp.float32) + b2_ref[...]
    h = jnp.maximum(h, 0.0)                                    # ReLU (VPU)
    h = jnp.dot(h, w3_ref[...], preferred_element_type=jnp.float32) + b3_ref[...]
    o_ref[...] = jnp.tanh(h).astype(o_ref.dtype)               # Tanh (EUP), lane-dense store


def _block_diag(w, p):
    """(fan_in, fan_out) -> (p*fan_in, p*fan_out) with `w` repeated on the diagonal."""
    return jnp.kron(jnp.eye(p, dtype=w.dtype), w)


def decoder_forward(x, params, *, batch_tile=8192, pack=8, min_grid_steps=4):
    """x: (B, in_features); params: w1,b1,w2,b2,w3,b3 with weights stored (in, out)."""
    w1, b1, w2, b2, w3, b3 = (params[k] for k in ("w1", "b1", "w2", "b2", "w3", "b3"))
    B, in_features = x.shape
    h1, h2 = w1.shape[1], w2.shape[1]
    out_features = w3.shape[1]
    dt = x.dtype
    p = max(1, int(pack))

    # ---- Batch packing (block-diagonal weights fill the MXU granules) -------
    # p=8 is tuned for this module's tiny widths (16/32/64/out); it only helps
    # while p*hidden stays around the 128/256 MXU granule.
    Bp = _round_up(B, p)
    if Bp != B:
        # Only when B % pack != 0: pads <= pack-1 rows (never a whole tile).
        x = jnp.pad(x, ((0, Bp - B), (0, 0)))
    R = Bp // p                                      # packed rows
    xp = x.reshape(R, p * in_features)               # free: rows are contiguous in HBM

    f = lambda a: a.astype(dt)                       # match x dtype -> no per-step casts
    w1_bd = _block_diag(f(w1), p); b1_bd = jnp.tile(f(b1), (1, p))
    w2_bd = _block_diag(f(w2), p); b2_bd = jnp.tile(f(b2), (1, p))
    w3_bd = _block_diag(f(w3), p); b3_bd = jnp.tile(f(b3), (1, p))

    # Lane-dense output slab: pad last-layer columns to a multiple of 128 so the
    # store is an unmasked vst; the zero columns are free on the MXU.
    n_out = p * out_features
    n_out_pad = _round_up(n_out, 128)
    if n_out_pad != n_out:
        w3_bd = jnp.pad(w3_bd, ((0, 0), (0, n_out_pad - n_out)))
        b3_bd = jnp.pad(b3_bd, ((0, 0), (0, n_out_pad - n_out)))

    # ---- Batch-tile sizing ----------------------------------------------------
    # Large tiles amortize per-step overhead; cap so the grid keeps >= min_grid_steps
    # steps when B is large (v7x: 2 TensorCores share the "parallel" batch axis).
    target_tr = max(8, _round_up(max(1, batch_tile // p), 8))
    cap_tr = max(8, _round_up(_cdiv(R, max(1, min_grid_steps)), 8))
    tr = min(target_tr, cap_tr, _round_up(R, 8))
    if tr > R:
        tr = R                                       # tiny batch: one whole-array block
    grid = (_cdiv(R, tr),)                           # partial last block is masked by Pallas

    const = lambda a: pl.BlockSpec(a.shape, lambda i: (0,) * a.ndim)  # VMEM-resident

    itemsize = lambda a: a.size * a.dtype.itemsize
    cost = pl.CostEstimate(
        flops=2 * R * p * p * (in_features * h1 + h1 * h2) + 2 * R * p * h2 * n_out_pad,
        transcendentals=R * n_out_pad,
        bytes_accessed=itemsize(xp) + R * n_out_pad * 4
        + sum(itemsize(a) for a in (w1_bd, b1_bd, w2_bd, b2_bd, w3_bd, b3_bd)),
    )

    out_slab = pl.pallas_call(
        decoder_kernel,
        out_shape=jax.ShapeDtypeStruct((R, n_out_pad), jnp.float32),
        grid_spec=pltpu.PrefetchScalarGridSpec(
            num_scalar_prefetch=0,
            grid=grid,
            in_specs=[
                pl.BlockSpec((tr, p * in_features), lambda i: (i, 0)),  # streamed packed x
                const(w1_bd), const(b1_bd),
                const(w2_bd), const(b2_bd),
                const(w3_bd), const(b3_bd),
            ],
            out_specs=pl.BlockSpec((tr, n_out_pad), lambda i: (i, 0)),  # lane-dense store
        ),
        compiler_params=pltpu.CompilerParams(
            dimension_semantics=("parallel",),       # shard the batch grid over TCs (v7x)
            vmem_limit_bytes=32 * 1024 * 1024,       # generous; residency is ~a few MiB
        ),
        cost_estimate=cost,
    )(xp, w1_bd, b1_bd, w2_bd, b2_bd, w3_bd, b3_bd)

    # Unpack: (R, n_out_pad) -> (Bp, out) -> (B, out).  The reshape is free; the
    # small column/row slices are tiny next to the x traffic.
    out = out_slab[:, :n_out].reshape(Bp, out_features)
    return out[:B] if Bp != B else out


def init_decoder_params(key, in_features, out_features, dtype=jnp.float32):
    """PyTorch-Linear-style init U(-1/sqrt(fan_in), 1/sqrt(fan_in)); weights stored (in, out)."""
    dims = [(in_features, 32), (32, 64), (64, out_features)]
    params = {}
    for i, (fan_in, fan_out) in enumerate(dims, start=1):
        key, kw, kb = jax.random.split(key, 3)
        bound = 1.0 / math.sqrt(fan_in)
        params[f"w{i}"] = jax.random.uniform(
            kw, (fan_in, fan_out), jnp.float32, minval=-bound, maxval=bound).astype(dtype)
        params[f"b{i}"] = jax.random.uniform(
            kb, (1, fan_out), jnp.float32, minval=-bound, maxval=bound).astype(dtype)
    return params


def decoder_reference(x, params):
    f32 = lambda a: a.astype(jnp.float32)
    h = jnp.maximum(x @ f32(params["w1"]) + f32(params["b1"]), 0.0)
    h = jnp.maximum(h @ f32(params["w2"]) + f32(params["b2"]), 0.0)
    return jnp.tanh(h @ f32(params["w3"]) + f32(params["b3"]))


if __name__ == "__main__":
    key = jax.random.PRNGKey(0)
    k_x, k_x2, k_p = jax.random.split(key, 3)

    batch, in_features, out_features = 8, 16, 8
    params = init_decoder_params(k_p, in_features, out_features)

    # Tiny batch: single grid step, whole-array block, packed pack=8 path.
    x = jax.random.normal(k_x, (batch, in_features), dtype=jnp.float32)
    out = decoder_forward(x, params)
    jax.block_until_ready(out)
    ref = decoder_reference(x, params)
    assert out.shape == (batch, out_features)
    assert jnp.allclose(out, ref, atol=1e-5, rtol=1e-5)

    # Multi-step grid: B not a multiple of pack (pads 5 rows), partial last block,
    # lane-padded output columns sliced off in the wrapper.
    x2 = jax.random.normal(k_x2, (83, in_features), dtype=jnp.float32)
    out2 = decoder_forward(x2, params, batch_tile=64)
    jax.block_until_ready(out2)
    ref2 = decoder_reference(x2, params)
    assert out2.shape == (83, out_features)
    assert jnp.allclose(out2, ref2, atol=1e-5, rtol=1e-5)

    print("KERNEL_OK")
</pallas_src>

<mosaic_0001>
module attributes {stable_mosaic.version = 11 : i64} {
  func.func @decoder_kernel(%arg0: i32, %arg1: memref<1x128xf32, #tpu.memory_space<vmem>>, %arg2: memref<128x256xf32, #tpu.memory_space<vmem>>, %arg3: memref<1x256xf32, #tpu.memory_space<vmem>>, %arg4: memref<256x512xf32, #tpu.memory_space<vmem>>, %arg5: memref<1x512xf32, #tpu.memory_space<vmem>>, %arg6: memref<512x128xf32, #tpu.memory_space<vmem>>, %arg7: memref<1x128xf32, #tpu.memory_space<vmem>>, %arg8: memref<1x128xf32, #tpu.memory_space<vmem>>) attributes {dimension_semantics = [#tpu.dimension_semantics<parallel>], iteration_bounds = array<i64: 1>, scalar_prefetch = 0 : i64, scratch_operands = 0 : i64, tpu.core_type = #tpu.core_type<tc>, window_params = [{transform_indices = @transform_0, window_bounds = array<i64: 1, 128>}, {pipeline_mode = #tpu.pipeline_mode<synchronous>, transform_indices = @transform_1, window_bounds = array<i64: 128, 256>}, {pipeline_mode = #tpu.pipeline_mode<synchronous>, transform_indices = @transform_2, window_bounds = array<i64: 1, 256>}, {pipeline_mode = #tpu.pipeline_mode<synchronous>, transform_indices = @transform_3, window_bounds = array<i64: 256, 512>}, {pipeline_mode = #tpu.pipeline_mode<synchronous>, transform_indices = @transform_4, window_bounds = array<i64: 1, 512>}, {pipeline_mode = #tpu.pipeline_mode<synchronous>, transform_indices = @transform_5, window_bounds = array<i64: 512, 128>}, {pipeline_mode = #tpu.pipeline_mode<synchronous>, transform_indices = @transform_6, window_bounds = array<i64: 1, 128>}, {transform_indices = @transform_7, window_bounds = array<i64: 1, 128>}]} {
    %c0 = arith.constant 0 : index
    %c0_0 = arith.constant 0 : index
    %0 = vector.load %arg1[%c0, %c0_0] : memref<1x128xf32, #tpu.memory_space<vmem>>, vector<1x128xf32>
    %c0_1 = arith.constant 0 : index
    %c0_2 = arith.constant 0 : index
    %1 = vector.load %arg2[%c0_1, %c0_2] : memref<128x256xf32, #tpu.memory_space<vmem>>, vector<128x256xf32>
    %cst = arith.constant dense<0.000000e+00> : vector<1x256xf32>
    %2 = tpu.matmul %0, %1, %cst {dimension_numbers = #tpu.dot_dimension_numbers<[1], [0], [0], [1], [0, 0, 1, 1], [], []>} : vector<1x128xf32>, vector<128x256xf32>, vector<1x256xf32> -> vector<1x256xf32>
    %c0_3 = arith.constant 0 : index
    %c0_4 = arith.constant 0 : index
    %3 = vector.load %arg3[%c0_3, %c0_4] : memref<1x256xf32, #tpu.memory_space<vmem>>, vector<1x256xf32>
    %4 = arith.addf %2, %3 : vector<1x256xf32>
    %cst_5 = arith.constant 0.000000e+00 : f32
    %5 = vector.broadcast %cst_5 : f32 to vector<1x256xf32>
    %6 = arith.maximumf %4, %5 : vector<1x256xf32>
    %c0_6 = arith.constant 0 : index
    %c0_7 = arith.constant 0 : index
    %7 = vector.load %arg4[%c0_6, %c0_7] : memref<256x512xf32, #tpu.memory_space<vmem>>, vector<256x512xf32>
    %cst_8 = arith.constant dense<0.000000e+00> : vector<1x512xf32>
    %8 = tpu.matmul %6, %7, %cst_8 {dimension_numbers = #tpu.dot_dimension_numbers<[1], [0], [0], [1], [0, 0, 1, 1], [], []>} : vector<1x256xf32>, vector<256x512xf32>, vector<1x512xf32> -> vector<1x512xf32>
    %c0_9 = arith.constant 0 : index
    %c0_10 = arith.constant 0 : index
    %9 = vector.load %arg5[%c0_9, %c0_10] : memref<1x512xf32, #tpu.memory_space<vmem>>, vector<1x512xf32>
    %10 = arith.addf %8, %9 : vector<1x512xf32>
    %cst_11 = arith.constant 0.000000e+00 : f32
    %11 = vector.broadcast %cst_11 : f32 to vector<1x512xf32>
    %12 = arith.maximumf %10, %11 : vector<1x512xf32>
    %c0_12 = arith.constant 0 : index
    %c0_13 = arith.constant 0 : index
    %13 = vector.load %arg6[%c0_12, %c0_13] : memref<512x128xf32, #tpu.memory_space<vmem>>, vector<512x128xf32>
    %cst_14 = arith.constant dense<0.000000e+00> : vector<1x128xf32>
    %14 = tpu.matmul %12, %13, %cst_14 {dimension_numbers = #tpu.dot_dimension_numbers<[1], [0], [0], [1], [0, 0, 1, 1], [], []>} : vector<1x512xf32>, vector<512x128xf32>, vector<1x128xf32> -> vector<1x128xf32>
    %c0_15 = arith.constant 0 : index
    %c0_16 = arith.constant 0 : index
    %15 = vector.load %arg7[%c0_15, %c0_16] : memref<1x128xf32, #tpu.memory_space<vmem>>, vector<1x128xf32>
    %16 = arith.addf %14, %15 : vector<1x128xf32>
    %17 = math.tanh %16 : vector<1x128xf32>
    %c0_17 = arith.constant 0 : index
    %c0_18 = arith.constant 0 : index
    %18 = vector.load %arg8[%c0_17, %c0_18] : memref<1x128xf32, #tpu.memory_space<vmem>>, vector<1x128xf32>
    tpu.vector_store %arg8[%c0_17, %c0_18], %17 {strides = array<i32>} : memref<1x128xf32, #tpu.memory_space<vmem>>, vector<1x128xf32>,
    return
  }
  func.func @transform_0(%arg0: i32) -> (i32, i32) {
    %c0_i32 = arith.constant 0 : i32
    %c0_i32_0 = arith.constant 0 : i32
    return %arg0, %c0_i32 : i32, i32
  }
  func.func @transform_1(%arg0: i32) -> (i32, i32) {
    %c0_i32 = arith.constant 0 : i32
    %c0_i32_0 = arith.constant 0 : i32
    %c0_i32_1 = arith.constant 0 : i32
    return %c0_i32, %c0_i32_0 : i32, i32
  }
  func.func @transform_2(%arg0: i32) -> (i32, i32) {
    %c0_i32 = arith.constant 0 : i32
    %c0_i32_0 = arith.constant 0 : i32
    %c0_i32_1 = arith.constant 0 : i32
    return %c0_i32, %c0_i32_0 : i32, i32
  }
  func.func @transform_3(%arg0: i32) -> (i32, i32) {
    %c0_i32 = arith.constant 0 : i32
    %c0_i32_0 = arith.constant 0 : i32
    %c0_i32_1 = arith.constant 0 : i32
    return %c0_i32, %c0_i32_0 : i32, i32
  }
  func.func @transform_4(%arg0: i32) -> (i32, i32) {
    %c0_i32 = arith.constant 0 : i32
    %c0_i32_0 = arith.constant 0 : i32
    %c0_i32_1 = arith.constant 0 : i32
    return %c0_i32, %c0_i32_0 : i32, i32
  }
  func.func @transform_5(%arg0: i32) -> (i32, i32) {
    %c0_i32 = arith.constant 0 : i32
    %c0_i32_0 = arith.constant 0 : i32
    %c0_i32_1 = arith.constant 0 : i32
    return %c0_i32, %c0_i32_0 : i32, i32
  }
  func.func @transform_6(%arg0: i32) -> (i32, i32) {
    %c0_i32 = arith.constant 0 : i32
    %c0_i32_0 = arith.constant 0 : i32
    %c0_i32_1 = arith.constant 0 : i32
    return %c0_i32, %c0_i32_0 : i32, i32
  }
  func.func @transform_7(%arg0: i32) -> (i32, i32) {
    %c0_i32 = arith.constant 0 : i32
    %c0_i32_0 = arith.constant 0 : i32
    return %arg0, %c0_i32 : i32, i32
  }
}

</mosaic_0001>

<bundles_post_ra>
// kernel: tpu_custom_call.1
= control target key start
LH: loop header
LB: loop body
LE: loop exit
PB: predicated region body
PF: predicated region fallthrough
CT: control target
= control target key end

     0   :  { %12 = vsyncpa [#allocation3], 0  ;;  %s1279_s0 = inlined_call_operand.hbm [shape: f32[1,128], index: 0, kind: input, shape index: {}]   ;;  %s1280_s1 = inlined_call_operand.hbm [shape: f32[128,256], index: 1, kind: input, shape index: {}]   ;;  %s1281_s2 = inlined_call_operand.vmem [shape: f32[1,256], index: 2, kind: input, shape index: {}]   ;;  %s1282_s3 = inlined_call_operand.hbm [shape: f32[256,512], index: 3, kind: input, shape index: {}]   ;;  %s1283_s4 = inlined_call_operand.vmem [shape: f32[1,512], index: 4, kind: input, shape index: {}]   ;;  %s1284_s5 = inlined_call_operand.hbm [shape: f32[512,128], index: 5, kind: input, shape index: {}]   ;;  %s1285_s6 = inlined_call_operand.vmem [shape: f32[1,128], index: 6, kind: input, shape index: {}]   ;;  %s1286_s7 = inlined_call_operand.hbm [shape: f32[1,128], index: 7, kind: output, shape index: {}]  }
   0x1   :  { %13 = vsyncpa [#allocation6], 0 }
   0x2   :  { %14 = vsyncpa [#allocation9], 0 }
   0x3   :  { %15 = vsyncpa [#allocation4], 0  ;;  %s1144_s24 = smov [#allocation5]   ;;  %s1026_s28 = scalar_lea.hbm %s1280_s1, 4096 }
   0x4   :  { %s31_s25 = sshll.u32 %s1144_s24, 4  ;;  %p1027_p0 = scmp.ne.s32.totalorder %s1280_s1, %s1026_s28  ;;  %s32_s25 = int_to_ptr.vmem [resolvable:$true] %s31_s25 }
   0x5   :  { %p1030_p1 = scmp.lt.u32.totalorder %s1026_s28, %s1280_s1 }
   0x7   :  { %p1032_p2 = pnand %p1030_p1, %p1027_p0 }
   0x9   :  { %1035 = shalt.err (!%p1032_p2)
}
   0xa   :  { %s1036_s10 = scalar_lea.vmem %s32_s25, 4096  ;;  %p1041_p4 = scmp.lt.s32.totalorder %s32_s25, %s32_s25 }
   0xb   :  { %p1037_p3 = scmp.ne.s32.totalorder %s32_s25, %s1036_s10  ;;  %p1042_p5 = scmp.lt.s32.totalorder %s1036_s10, %s1036_s10 }
   0xd   :  { %p1043_p6 = por %p1042_p5, %p1041_p4 }
   0xf   :  { %p1044_p7 = pnand %p1043_p6, %p1037_p3 }
  0x11   :  { %1047 = shalt.err (!%p1044_p7)
}
  0x12   :  { %s1145_s11 = smov 256   ;;  %s1146_s12 = smov 16  }
  0x13   :  { %37 = dma.hbm_to_vmem [thread:$0]  %s1280_s1, 4096, %s32_s25, [#allocation6], %s1145_s11, %s1145_s11, %s1146_s12  }
  0x14   :  { %s1147_s15 = smov [#allocation2]   ;;  %s1148_s17 = smov [#allocation7]  }
  0x15   :  { %s22_s16 = sshll.u32 %s1147_s15, 4  ;;  %s45_s18 = sshll.u32 %s1148_s17, 4  ;;  %s23_s16 = int_to_ptr.vmem [resolvable:$true] %s22_s16  ;;  %s46_s18 = int_to_ptr.vmem [resolvable:$true] %s45_s18 }
  0x16   :  { %s1048_s21 = scalar_lea.hbm %s1279_s0, 16 }
  0x17   :  { %p1049_p8 = scmp.ne.s32.totalorder %s1279_s0, %s1048_s21  ;;  %p1052_p9 = scmp.lt.u32.totalorder %s1048_s21, %s1279_s0 }
  0x19   :  { %p1054_p10 = pnand %p1052_p9, %p1049_p8 }
  0x1b   :  { %1057 = shalt.err (!%p1054_p10)
}
  0x1c   :  { %s1058_s1 = scalar_lea.vmem %s23_s16, 16  ;;  %s1062_s25 = scalar_lea.vmem %s23_s16, 32 }
  0x1d   :  { %p1059_p11 = scmp.ne.s32.totalorder %s23_s16, %s1058_s1  ;;  %p1063_p12 = scmp.lt.s32.totalorder %s23_s16, %s23_s16 }
  0x1e   :  { %p1064_p13 = scmp.lt.s32.totalorder %s1062_s25, %s1058_s1 }
  0x20   :  { %p1065_p0 = por %p1064_p13, %p1063_p12 }
  0x22   :  { %p1066_p1 = pnand %p1065_p0, %p1059_p11 }
  0x24   :  { %1069 = shalt.err (!%p1066_p1)
}
  0x25   :  { %25 = dma.hbm_to_vmem [thread:$0]  %s1279_s0, 16, %s23_s16, [#allocation3]  }
  0x26   :  { %s1070_s8 = scalar_lea.hbm %s1282_s3, 16384 }
  0x27   :  { %p1071_p2 = scmp.ne.s32.totalorder %s1282_s3, %s1070_s8  ;;  %p1074_p3 = scmp.lt.u32.totalorder %s1070_s8, %s1282_s3 }
  0x29   :  { %p1076_p4 = pnand %p1074_p3, %p1071_p2 }
  0x2b   :  { %1079 = shalt.err (!%p1076_p4)
}
  0x2c   :  { %s1080_s13 = scalar_lea.vmem %s46_s18, 16384  ;;  %p1085_p6 = scmp.lt.s32.totalorder %s46_s18, %s46_s18 }
  0x2d   :  { %p1081_p5 = scmp.ne.s32.totalorder %s46_s18, %s1080_s13  ;;  %p1086_p7 = scmp.lt.s32.totalorder %s1080_s13, %s1080_s13 }
  0x2f   :  { %p1087_p8 = por %p1086_p7, %p1085_p6 }
  0x31   :  { %p1088_p9 = pnand %p1087_p8, %p1081_p5 }
  0x33   :  { %1091 = shalt.err (!%p1088_p9)
}
  0x34   :  { %s1149_s0 = smov 512   ;;  %s1150_s14 = smov 32  }
  0x35   :  { %51 = dma.hbm_to_vmem [thread:$0]  %s1282_s3, 16384, %s46_s18, [#allocation6], %s1149_s0, %s1149_s0, %s1150_s14  }
  0x36   :  { %s1151_s17 = smov [#allocation8]   ;;  %s1092_s22 = scalar_lea.hbm %s1284_s5, 8192 }
  0x37   :  { %s59_s19 = sshll.u32 %s1151_s17, 4  ;;  %p1093_p10 = scmp.ne.s32.totalorder %s1284_s5, %s1092_s22  ;;  %s60_s19 = int_to_ptr.vmem [resolvable:$true] %s59_s19 }
  0x38   :  { %p1096_p11 = scmp.lt.u32.totalorder %s1092_s22, %s1284_s5 }
  0x3a   :  { %p1098_p12 = pnand %p1096_p11, %p1093_p10 }
  0x3c   :  { %1101 = shalt.err (!%p1098_p12)
}
  0x3d   :  { %s1102_s25 = scalar_lea.vmem %s60_s19, 8192  ;;  %p1107_p0 = scmp.lt.s32.totalorder %s60_s19, %s60_s19 }
  0x3e   :  { %p1103_p13 = scmp.ne.s32.totalorder %s60_s19, %s1102_s25  ;;  %p1108_p1 = scmp.lt.s32.totalorder %s1102_s25, %s1102_s25 }
  0x40   :  { %p1109_p2 = por %p1108_p1, %p1107_p0 }
  0x42   :  { %p1110_p3 = pnand %p1109_p2, %p1103_p13 }
  0x44   :  { %1113 = shalt.err (!%p1110_p3)
}
  0x45   :  { %s1152_s3 = smov 128   ;;  %s1153_s18 = smov 8  }
  0x46   :  { %65 = dma.hbm_to_vmem [thread:$0]  %s1284_s5, 8192, %s60_s19, [#allocation9], %s1152_s3, %s1152_s3, %s1153_s18  }
  0x47   :  { %1136 = dma.done.wait [#allocation3], 16  }
  0x48   :  { %1137 = vsyncadd [#allocation3], 4294967280 }
  0x49   :  { %1138 = dma.done.wait [#allocation6], 20480  }
  0x4a   :  { %1139 = vsyncadd [#allocation6], 4294946816 }
  0x4b   :  { %1140 = dma.done.wait [#allocation9], 8192  }
  0x4c   :  { %1141 = vsyncadd [#allocation9], 4294959104  ;;  %v1154_v0 = vmov 0.0   ;;  %v82_v1 = vld [vmem:[#allocation5 + $0x8] sm:$0xff]  ;;  %v84_v2 = vld [vmem:[#allocation5 + $0x18] sm:$0xff]  ;;  %s1155_s9 = smov [#allocation10]  }
  0x4d   :  { %189 = vmatprep.mubr.f32.mxu0 %v1154_v0  ;;  %v81_v3 = vld [vmem:[#allocation5] sm:$0xff]  ;;  %v788_v4 = vpack.c.bf16 %v84_v2, %v82_v1  ;;  %v83_v5 = vld [vmem:[#allocation5 + $0x10] sm:$0xff]  ;;  %v86_v6 = vld [vmem:[#allocation5 + $0x28] sm:$0xff]  ;;  %s707_s10 = sshll.u32 %s1155_s9, 4  ;;  %s708_s10 = int_to_ptr.vmem [resolvable:$true] %s707_s10 }
  0x4e   :  { %v88_v7 = vld [vmem:[#allocation5 + $0x38] sm:$0xff]  ;;  %v790_v8 = vpack.c.bf16 %v83_v5, %v81_v3  ;;  %v85_v10 = vld [vmem:[#allocation5 + $0x20] sm:$0xff]  ;;  %v87_v11 = vld [vmem:[#allocation5 + $0x30] sm:$0xff]  ;;  %s1114_s11 = scalar_lea.vmem %s708_s10, 16  ;;  %s1118_s12 = scalar_lea.vmem %s708_s10, 32 }
  0x4f   :  { %v792_v9 = vpack.c.bf16 %v88_v7, %v86_v6  ;;  %v90_v12 = vld [vmem:[#allocation5 + $0x48] sm:$0xff]  ;;  %789 = vmatprep.subr.bf16.mxu0 %v788_v4  ;;  %v92_v13 = vld [vmem:[#allocation5 + $0x58] sm:$0xff]  ;;  %v794_v14 = vpack.c.bf16 %v87_v11, %v85_v10  ;;  %v89_v16 = vld [vmem:[#allocation5 + $0x40] sm:$0xff]  ;;  %p1115_p4 = scmp.ne.s32.totalorder %s708_s10, %s1114_s11  ;;  %p1119_p5 = scmp.lt.s32.totalorder %s708_s10, %s708_s10 }
  0x50   :  { %791 = vmatpush1.bf16.msra.mxu0 %v790_v8  ;;  %v796_v15 = vpack.c.bf16 %v92_v13, %v90_v12  ;;  %v91_v17 = vld [vmem:[#allocation5 + $0x50] sm:$0xff]  ;;  %v94_v18 = vld [vmem:[#allocation5 + $0x68] sm:$0xff]  ;;  %v96_v19 = vld [vmem:[#allocation5 + $0x78] sm:$0xff]  ;;  %p1120_p6 = scmp.lt.s32.totalorder %s1118_s12, %s1114_s11 }
  0x51   :  { %793 = vmatprep.subr.bf16.mxu0 %v792_v9  ;;  %v798_v20 = vpack.c.bf16 %v91_v17, %v89_v16  ;;  %v800_v21 = vpack.c.bf16 %v96_v19, %v94_v18  ;;  %v93_v22 = vld [vmem:[#allocation5 + $0x60] sm:$0xff]  ;;  %v95_v23 = vld [vmem:[#allocation5 + $0x70] sm:$0xff]  ;;  %v98_v24 = vld [vmem:[#allocation5 + $0x88] sm:$0xff] }
  0x52   :  { %v100_v25 = vld [vmem:[#allocation5 + $0x98] sm:$0xff]  ;;  %v199_v26 = vld [vmem:[#allocation7 + $0x8] sm:$0xff]  ;;  %v802_v28 = vpack.c.bf16 %v95_v23, %v93_v22  ;;  %v198_v30 = vld [vmem:[#allocation7] sm:$0xff]  ;;  %p1121_p7 = por %p1120_p6, %p1119_p5 }
  0x53   :  { %v203_v27 = vld [vmem:[#allocation7 + $0x28] sm:$0xff]  ;;  %v202_v31 = vld [vmem:[#allocation7 + $0x20] sm:$0xff]  ;;  %v804_v32 = vpack.c.bf16 %v100_v25, %v98_v24  ;;  %v99_v34 = vld [vmem:[#allocation5 + $0x90] sm:$0xff] }
  0x54   :  { %795 = vmatpush1.bf16.msra.mxu0 %v794_v14  ;;  %v820_v29 = vpack.c.bf16 %v203_v27, %v199_v26  ;;  %v97_v33 = vld [vmem:[#allocation5 + $0x80] sm:$0xff]  ;;  %v822_v35 = vpack.c.bf16 %v202_v31, %v198_v30  ;;  %v207_v36 = vld [vmem:[#allocation7 + $0x48] sm:$0xff]  ;;  %v104_v38 = vld [vmem:[#allocation5 + $0xb8] sm:$0xff]  ;;  %p1122_p8 = pnand %p1121_p7, %p1115_p4 }
  0x55   :  { %797 = vmatprep.subr.bf16.mxu0 %v796_v15  ;;  %v102_v37 = vld [vmem:[#allocation5 + $0xa8] sm:$0xff]  ;;  %v206_v41 = vld [vmem:[#allocation7 + $0x40] sm:$0xff]  ;;  %v806_v43 = vpack.c.bf16 %v99_v34, %v97_v33  ;;  %v103_v49 = vld [vmem:[#allocation5 + $0xb0] sm:$0xff] }
  0x56   :  { %821 = vmatprep.subr.bf16.mxu1 %v820_v29  ;;  %v211_v39 = vld [vmem:[#allocation7 + $0x68] sm:$0xff]  ;;  %v210_v42 = vld [vmem:[#allocation7 + $0x60] sm:$0xff]  ;;  %v808_v47 = vpack.c.bf16 %v104_v38, %v102_v37  ;;  %v108_v53 = vld [vmem:[#allocation5 + $0xd8] sm:$0xff] }
  0x57   :  { %823 = vmatpush1.bf16.msra.mxu1 %v822_v35  ;;  %v824_v40 = vpack.c.bf16 %v211_v39, %v207_v36  ;;  %v826_v44 = vpack.c.bf16 %v210_v42, %v206_v41  ;;  %v215_v45 = vld [vmem:[#allocation7 + $0x88] sm:$0xff]  ;;  %v101_v48 = vld [vmem:[#allocation5 + $0xa0] sm:$0xff]  ;;  %v107_v0 = vld [vmem:[#allocation5 + $0xd0] sm:$0xff] }
  0x58   :  { %799 = vmatpush1.bf16.msra.mxu0 %v798_v20  ;;  %v219_v46 = vld [vmem:[#allocation7 + $0xa8] sm:$0xff]  ;;  %v214_v51 = vld [vmem:[#allocation7 + $0x80] sm:$0xff]  ;;  %v810_v58 = vpack.c.bf16 %v103_v49, %v101_v48  ;;  %v112_v3 = vld [vmem:[#allocation5 + $0xf8] sm:$0xff] }
  0x59   :  { %801 = vmatprep.subr.bf16.mxu0 %v800_v21  ;;  %825 = vmatprep.subr.bf16.mxu1 %v824_v40  ;;  %v828_v50 = vpack.c.bf16 %v219_v46, %v215_v45  ;;  %v106_v52 = vld [vmem:[#allocation5 + $0xc8] sm:$0xff]  ;;  %v218_v54 = vld [vmem:[#allocation7 + $0xa0] sm:$0xff]  ;;  %v111_v12 = vld [vmem:[#allocation5 + $0xf0] sm:$0xff] }
  0x5a   :  { %v830_v55 = vpack.c.bf16 %v218_v54, %v214_v51  ;;  %v223_v56 = vld [vmem:[#allocation7 + $0xc8] sm:$0xff]  ;;  %v222_v60 = vld [vmem:[#allocation7 + $0xc0] sm:$0xff]  ;;  %v812_v62 = vpack.c.bf16 %v108_v53, %v106_v52  ;;  %v201_v15 = vld [vmem:[#allocation7 + $0x18] sm:$0xff] }
  0x5b   :  { %827 = vmatpush1.bf16.msra.mxu1 %v826_v44  ;;  %v227_v57 = vld [vmem:[#allocation7 + $0xe8] sm:$0xff]  ;;  %v226_v61 = vld [vmem:[#allocation7 + $0xe0] sm:$0xff]  ;;  %v205_v16 = vld [vmem:[#allocation7 + $0x38] sm:$0xff] }
  0x5c   :  { %803 = vmatpush1.bf16.msra.mxu0 %v802_v28  ;;  %829 = vmatprep.subr.bf16.mxu1 %v828_v50  ;;  %v832_v59 = vpack.c.bf16 %v227_v57, %v223_v56  ;;  %v105_v63 = vld [vmem:[#allocation5 + $0xc0] sm:$0xff]  ;;  %v231_v1 = vld [vmem:[#allocation7 + $0x108] sm:$0xff]  ;;  %v834_v5 = vpack.c.bf16 %v226_v61, %v222_v60  ;;  %v200_v19 = vld [vmem:[#allocation7 + $0x10] sm:$0xff]  ;;  %v884_v23 = vpack.c.bf16 %v205_v16, %v201_v15 }
  0x5d   :  { %805 = vmatprep.subr.bf16.mxu0 %v804_v32  ;;  %v110_v2 = vld [vmem:[#allocation5 + $0xe8] sm:$0xff]  ;;  %v814_v6 = vpack.c.bf16 %v107_v0, %v105_v63  ;;  %v109_v7 = vld [vmem:[#allocation5 + $0xe0] sm:$0xff]  ;;  %v204_v24 = vld [vmem:[#allocation7 + $0x30] sm:$0xff] }
  0x5e   :  { %v235_v4 = vld [vmem:[#allocation7 + $0x128] sm:$0xff]  ;;  %v230_v9 = vld [vmem:[#allocation7 + $0x100] sm:$0xff]  ;;  %v816_v11 = vpack.c.bf16 %v112_v3, %v110_v2  ;;  %v818_v18 = vpack.c.bf16 %v111_v12, %v109_v7  ;;  %v209_v27 = vld [vmem:[#allocation7 + $0x58] sm:$0xff]  ;;  %v886_v31 = vpack.c.bf16 %v204_v24, %v200_v19 }
  0x5f   :  { %831 = vmatpush1.bf16.msra.mxu1 %v830_v55  ;;  %v836_v8 = vpack.c.bf16 %v235_v4, %v231_v1  ;;  %v234_v10 = vld [vmem:[#allocation7 + $0x120] sm:$0xff]  ;;  %v239_v13 = vld [vmem:[#allocation7 + $0x148] sm:$0xff]  ;;  %v213_v28 = vld [vmem:[#allocation7 + $0x78] sm:$0xff] }
  0x60   :  { %807 = vmatpush1.bf16.msra.mxu0 %v806_v43  ;;  %833 = vmatprep.subr.bf16.mxu1 %v832_v59  ;;  %v243_v14 = vld [vmem:[#allocation7 + $0x168] sm:$0xff]  ;;  %v838_v17 = vpack.c.bf16 %v234_v10, %v230_v9  ;;  %v238_v21 = vld [vmem:[#allocation7 + $0x140] sm:$0xff]  ;;  %v80_v29 = vld [vmem:[#allocation2] sm:$0x1]  ;;  %v888_v36 = vpack.c.bf16 %v213_v28, %v209_v27 }
  0x61   :  { %809 = vmatprep.subr.bf16.mxu0 %v808_v47  ;;  %v840_v20 = vpack.c.bf16 %v243_v14, %v239_v13  ;;  %v242_v22 = vld [vmem:[#allocation7 + $0x160] sm:$0xff]  ;;  %v247_v25 = vld [vmem:[#allocation7 + $0x188] sm:$0xff]  ;;  %v208_v32 = vld [vmem:[#allocation7 + $0x50] sm:$0xff] }
  0x62   :  { %v251_v26 = vld [vmem:[#allocation7 + $0x1a8] sm:$0xff]  ;;  %v842_v30 = vpack.c.bf16 %v242_v22, %v238_v21  ;;  %v246_v34 = vld [vmem:[#allocation7 + $0x180] sm:$0xff]  ;;  %v212_v37 = vld [vmem:[#allocation7 + $0x70] sm:$0xff] }
  0x63   :  { %835 = vmatpush1.bf16.msra.mxu1 %v834_v5  ;;  %v844_v33 = vpack.c.bf16 %v251_v26, %v247_v25  ;;  %v250_v35 = vld [vmem:[#allocation7 + $0x1a0] sm:$0xff]  ;;  %v255_v38 = vld [vmem:[#allocation7 + $0x1c8] sm:$0xff]  ;;  %v217_v40 = vld [vmem:[#allocation7 + $0x98] sm:$0xff]  ;;  %v890_v43 = vpack.c.bf16 %v212_v37, %v208_v32 }
  0x64   :  { %811 = vmatpush1.bf16.msra.mxu0 %v810_v58  ;;  %837 = vmatprep.subr.bf16.mxu1 %v836_v8  ;;  %v259_v39 = vld [vmem:[#allocation7 + $0x1e8] sm:$0xff]  ;;  %v221_v41 = vld [vmem:[#allocation7 + $0xb8] sm:$0xff]  ;;  %v846_v42 = vpack.c.bf16 %v250_v35, %v246_v34  ;;  %v216_v44 = vld [vmem:[#allocation7 + $0x90] sm:$0xff] }
  0x65   :  { %813 = vmatprep.subr.bf16.mxu0 %v812_v62  ;;  %v848_v45 = vpack.c.bf16 %v259_v39, %v255_v38  ;;  %v254_v46 = vld [vmem:[#allocation7 + $0x1c0] sm:$0xff]  ;;  %v892_v48 = vpack.c.bf16 %v221_v41, %v217_v40  ;;  %v220_v49 = vld [vmem:[#allocation7 + $0xb0] sm:$0xff]  ;;  %v263_v50 = vld [vmem:[#allocation7 + $0x208] sm:$0xff] }
  0x66   :  { %v258_v47 = vld [vmem:[#allocation7 + $0x1e0] sm:$0xff]  ;;  %v267_v51 = vld [vmem:[#allocation7 + $0x228] sm:$0xff]  ;;  %v225_v52 = vld [vmem:[#allocation7 + $0xd8] sm:$0xff]  ;;  %v894_v55 = vpack.c.bf16 %v220_v49, %v216_v44 }
  0x67   :  { %839 = vmatpush1.bf16.msra.mxu1 %v838_v17  ;;  %v229_v53 = vld [vmem:[#allocation7 + $0xf8] sm:$0xff]  ;;  %v850_v54 = vpack.c.bf16 %v258_v47, %v254_v46  ;;  %v224_v56 = vld [vmem:[#allocation7 + $0xd0] sm:$0xff]  ;;  %v852_v57 = vpack.c.bf16 %v267_v51, %v263_v50  ;;  %v262_v58 = vld [vmem:[#allocation7 + $0x200] sm:$0xff] }
  0x68   :  { %815 = vmatpush1.bf16.msra.mxu0 %v814_v6  ;;  %841 = vmatprep.subr.bf16.mxu1 %v840_v20  ;;  %v266_v59 = vld [vmem:[#allocation7 + $0x220] sm:$0xff]  ;;  %v896_v60 = vpack.c.bf16 %v229_v53, %v225_v52  ;;  %v228_v61 = vld [vmem:[#allocation7 + $0xf0] sm:$0xff]  ;;  %v271_v62 = vld [vmem:[#allocation7 + $0x248] sm:$0xff] }
  0x69   :  { %817 = vmatprep.subr.bf16.mxu0 %v816_v11  ;;  %v275_v63 = vld [vmem:[#allocation7 + $0x268] sm:$0xff]  ;;  %v233_v0 = vld [vmem:[#allocation7 + $0x118] sm:$0xff]  ;;  %v854_v2 = vpack.c.bf16 %v266_v59, %v262_v58  ;;  %v898_v3 = vpack.c.bf16 %v228_v61, %v224_v56  ;;  %v232_v4 = vld [vmem:[#allocation7 + $0x110] sm:$0xff] }
  0x6a   :  { %v237_v1 = vld [vmem:[#allocation7 + $0x138] sm:$0xff]  ;;  %v856_v5 = vpack.c.bf16 %v275_v63, %v271_v62  ;;  %v270_v6 = vld [vmem:[#allocation7 + $0x240] sm:$0xff]  ;;  %v236_v9 = vld [vmem:[#allocation7 + $0x130] sm:$0xff] }
  0x6b   :  { %843 = vmatpush1.bf16.msra.mxu1 %v842_v30  ;;  %v274_v7 = vld [vmem:[#allocation7 + $0x260] sm:$0xff]  ;;  %v900_v8 = vpack.c.bf16 %v237_v1, %v233_v0  ;;  %v279_v10 = vld [vmem:[#allocation7 + $0x288] sm:$0xff]  ;;  %v241_v12 = vld [vmem:[#allocation7 + $0x158] sm:$0xff]  ;;  %v902_v15 = vpack.c.bf16 %v236_v9, %v232_v4 }
  0x6c   :  { %819 = vmatpush1.bf16.msra.mxu0 %v818_v18  ;;  %845 = vmatprep.subr.bf16.mxu1 %v844_v33  ;;  %v283_v11 = vld [vmem:[#allocation7 + $0x2a8] sm:$0xff]  ;;  %v245_v13 = vld [vmem:[#allocation7 + $0x178] sm:$0xff]  ;;  %v858_v14 = vpack.c.bf16 %v274_v7, %v270_v6  ;;  %v240_v16 = vld [vmem:[#allocation7 + $0x150] sm:$0xff] }
  0x6d   :  { %885 = vmatprep.subr.bf16.mxu0 %v884_v23  ;;  %v860_v17 = vpack.c.bf16 %v283_v11, %v279_v10  ;;  %v278_v18 = vld [vmem:[#allocation7 + $0x280] sm:$0xff]  ;;  %v904_v20 = vpack.c.bf16 %v245_v13, %v241_v12  ;;  %v244_v21 = vld [vmem:[#allocation7 + $0x170] sm:$0xff]  ;;  %v287_v22 = vld [vmem:[#allocation7 + $0x2c8] sm:$0xff] }
  0x6e   :  { %v282_v19 = vld [vmem:[#allocation7 + $0x2a0] sm:$0xff]  ;;  %v291_v23 = vld [vmem:[#allocation7 + $0x2e8] sm:$0xff]  ;;  %v249_v24 = vld [vmem:[#allocation7 + $0x198] sm:$0xff]  ;;  %v906_v27 = vpack.c.bf16 %v244_v21, %v240_v16 }
  0x6f   :  { %190 = vmatmul.mubr.f32.vlgmr.msra.gmra.mrb[0].mxu0 %v80_v29  ;;  %847 = vmatpush1.bf16.msra.mxu1 %v846_v42  ;;  %v253_v25 = vld [vmem:[#allocation7 + $0x1b8] sm:$0xff]  ;;  %v862_v26 = vpack.c.bf16 %v282_v19, %v278_v18  ;;  %v248_v28 = vld [vmem:[#allocation7 + $0x190] sm:$0xff]  ;;  %v864_v29 = vpack.c.bf16 %v291_v23, %v287_v22  ;;  %v286_v30 = vld [vmem:[#allocation7 + $0x2c0] sm:$0xff] }
  0x70   :  { %887 = vmatpush1.bf16.msra.mxu0 %v886_v31  ;;  %849 = vmatprep.subr.bf16.mxu1 %v848_v45  ;;  %v290_v31 = vld [vmem:[#allocation7 + $0x2e0] sm:$0xff]  ;;  %v908_v32 = vpack.c.bf16 %v253_v25, %v249_v24  ;;  %v252_v33 = vld [vmem:[#allocation7 + $0x1b0] sm:$0xff]  ;;  %v295_v34 = vld [vmem:[#allocation7 + $0x308] sm:$0xff] }
  0x71   :  { %889 = vmatprep.subr.bf16.mxu0 %v888_v36  ;;  %v299_v35 = vld [vmem:[#allocation7 + $0x328] sm:$0xff]  ;;  %v257_v36 = vld [vmem:[#allocation7 + $0x1d8] sm:$0xff]  ;;  %v866_v38 = vpack.c.bf16 %v290_v31, %v286_v30  ;;  %v910_v39 = vpack.c.bf16 %v252_v33, %v248_v28  ;;  %v256_v40 = vld [vmem:[#allocation7 + $0x1d0] sm:$0xff] }
  0x72   :  { %v261_v37 = vld [vmem:[#allocation7 + $0x1f8] sm:$0xff]  ;;  %v868_v41 = vpack.c.bf16 %v299_v35, %v295_v34  ;;  %v294_v42 = vld [vmem:[#allocation7 + $0x300] sm:$0xff]  ;;  %v260_v45 = vld [vmem:[#allocation7 + $0x1f0] sm:$0xff] }
  0x73   :  { %851 = vmatpush1.bf16.msra.mxu1 %v850_v54  ;;  %v912_v44 = vpack.c.bf16 %v261_v37, %v257_v36  ;;  %v303_v46 = vld [vmem:[#allocation7 + $0x348] sm:$0xff]  ;;  %v269_v49 = vld [vmem:[#allocation7 + $0x238] sm:$0xff]  ;;  %v914_v51 = vpack.c.bf16 %v260_v45, %v256_v40  ;;  %v264_v52 = vld [vmem:[#allocation7 + $0x210] sm:$0xff] }
  0x74   :  { %891 = vmatpush1.bf16.msra.mxu0 %v890_v43  ;;  %853 = vmatprep.subr.bf16.mxu1 %v852_v57  ;;  %v298_v43 = vld [vmem:[#allocation7 + $0x320] sm:$0xff]  ;;  %v307_v47 = vld [vmem:[#allocation7 + $0x368] sm:$0xff]  ;;  %v268_v57 = vld [vmem:[#allocation7 + $0x230] sm:$0xff] }
  0x75   :  { %893 = vmatprep.subr.bf16.mxu0 %v892_v48  ;;  %v265_v48 = vld [vmem:[#allocation7 + $0x218] sm:$0xff]  ;;  %v870_v50 = vpack.c.bf16 %v298_v43, %v294_v42  ;;  %v872_v53 = vpack.c.bf16 %v307_v47, %v303_v46  ;;  %v302_v54 = vld [vmem:[#allocation7 + $0x340] sm:$0xff]  ;;  %v311_v58 = vld [vmem:[#allocation7 + $0x388] sm:$0xff]  ;;  %v918_v63 = vpack.c.bf16 %v268_v57, %v264_v52 }
  0x76   :  { %v916_v56 = vpack.c.bf16 %v269_v49, %v265_v48  ;;  %v315_v59 = vld [vmem:[#allocation7 + $0x3a8] sm:$0xff]  ;;  %v277_v61 = vld [vmem:[#allocation7 + $0x278] sm:$0xff]  ;;  %v284_v9 = vld [vmem:[#allocation7 + $0x2b0] sm:$0xff] }
  0x77   :  { %855 = vmatpush1.bf16.msra.mxu1 %v854_v2  ;;  %v876_v0 = vpack.c.bf16 %v315_v59, %v311_v58  ;;  %v272_v2 = vld [vmem:[#allocation7 + $0x250] sm:$0xff]  ;;  %v281_v4 = vld [vmem:[#allocation7 + $0x298] sm:$0xff]  ;;  %v314_v33 = vld [vmem:[#allocation7 + $0x3a0] sm:$0xff] }
  0x78   :  { %895 = vmatpush1.bf16.msra.mxu0 %v894_v55  ;;  %857 = vmatprep.subr.bf16.mxu1 %v856_v5  ;;  %v306_v55 = vld [vmem:[#allocation7 + $0x360] sm:$0xff]  ;;  %v285_v5 = vld [vmem:[#allocation7 + $0x2b8] sm:$0xff]  ;;  %v300_v21 = vld [vmem:[#allocation7 + $0x330] sm:$0xff] }
  0x79   :  { %897 = vmatprep.subr.bf16.mxu0 %v896_v60  ;;  %v273_v60 = vld [vmem:[#allocation7 + $0x258] sm:$0xff]  ;;  %v874_v62 = vpack.c.bf16 %v306_v55, %v302_v54  ;;  %v924_v7 = vpack.c.bf16 %v285_v5, %v281_v4  ;;  %v312_v34 = vld [vmem:[#allocation7 + $0x390] sm:$0xff]  ;;  %v318_v43 = vld [vmem:[#allocation7 + $0x3c0] sm:$0xff] }
  0x7a   :  { %v920_v1 = vpack.c.bf16 %v277_v61, %v273_v60  ;;  %v289_v10 = vld [vmem:[#allocation7 + $0x2d8] sm:$0xff]  ;;  %v316_v36 = vld [vmem:[#allocation7 + $0x3b0] sm:$0xff]  ;;  %v542_v52 = vld [vmem:[#allocation8 + $0x180] sm:$0xff] }
  0x7b   :  { %859 = vmatpush1.bf16.msra.mxu1 %v858_v14  ;;  %v293_v11 = vld [vmem:[#allocation7 + $0x2f8] sm:$0xff]  ;;  %v288_v14 = vld [vmem:[#allocation7 + $0x2d0] sm:$0xff]  ;;  %v942_v37 = vpack.c.bf16 %v316_v36, %v312_v34  ;;  %v543_v54 = vld [vmem:[#allocation8 + $0x188] sm:$0xff] }
  0x7c   :  { %899 = vmatpush1.bf16.msra.mxu0 %v898_v3  ;;  %861 = vmatprep.subr.bf16.mxu1 %v860_v17  ;;  %v276_v3 = vld [vmem:[#allocation7 + $0x270] sm:$0xff]  ;;  %v928_v13 = vpack.c.bf16 %v293_v11, %v289_v10  ;;  %v297_v16 = vld [vmem:[#allocation7 + $0x318] sm:$0xff]  ;;  %v980_v55 = vpack.c.bf16 %v543_v54, %v542_v52  ;;  %v113_v59 = vld [vmem:[%s1281_s2] sm:$0x3] }
  0x7d   :  { %901 = vmatprep.subr.bf16.mxu0 %v900_v8  ;;  %v922_v6 = vpack.c.bf16 %v276_v3, %v272_v2  ;;  %v280_v8 = vld [vmem:[#allocation7 + $0x290] sm:$0xff]  ;;  %v301_v17 = vld [vmem:[#allocation7 + $0x338] sm:$0xff]  ;;  %v526_v4 = vld [vmem:[#allocation8 + $0x100] sm:$0xff] }
  0x7e   :  { %v926_v12 = vpack.c.bf16 %v284_v9, %v280_v8  ;;  %v932_v19 = vpack.c.bf16 %v301_v17, %v297_v16  ;;  %v305_v22 = vld [vmem:[#allocation7 + $0x358] sm:$0xff]  ;;  %v320_v47 = vld [vmem:[#allocation7 + $0x3d0] sm:$0xff]  ;;  %v527_v5 = vld [vmem:[#allocation8 + $0x108] sm:$0xff] }
  0x7f   :  { %863 = vmatpush1.bf16.msra.mxu1 %v862_v26  ;;  %v309_v23 = vld [vmem:[#allocation7 + $0x378] sm:$0xff]  ;;  %v304_v26 = vld [vmem:[#allocation7 + $0x350] sm:$0xff]  ;;  %v503_v52 = vld [vmem:[#allocation8 + $0x48] sm:$0xff] }
  0x80   :  { %903 = vmatpush1.bf16.msra.mxu0 %v902_v15  ;;  %865 = vmatprep.subr.bf16.mxu1 %v864_v29  ;;  %v292_v15 = vld [vmem:[#allocation7 + $0x2f0] sm:$0xff]  ;;  %v936_v25 = vpack.c.bf16 %v309_v23, %v305_v22  ;;  %v313_v28 = vld [vmem:[#allocation7 + $0x398] sm:$0xff]  ;;  %v515_v22 = vld [vmem:[#allocation8 + $0xa8] sm:$0xff] }
  0x81   :  { %905 = vmatprep.subr.bf16.mxu0 %v904_v20  ;;  %v930_v18 = vpack.c.bf16 %v292_v15, %v288_v14  ;;  %v296_v20 = vld [vmem:[#allocation7 + $0x310] sm:$0xff]  ;;  %v317_v29 = vld [vmem:[#allocation7 + $0x3b8] sm:$0xff]  ;;  %v546_v23 = vld [vmem:[#allocation8 + $0x1a0] sm:$0xff] }
  0x82   :  { %v934_v24 = vpack.c.bf16 %v300_v21, %v296_v20  ;;  %v940_v31 = vpack.c.bf16 %v317_v29, %v313_v28  ;;  %v321_v40 = vld [vmem:[#allocation7 + $0x3d8] sm:$0xff]  ;;  %v324_v48 = vld [vmem:[#allocation7 + $0x3f0] sm:$0xff]  ;;  %v514_v21 = vld [vmem:[#allocation8 + $0xa0] sm:$0xff] }
  0x83   :  { %867 = vmatpush1.bf16.msra.mxu1 %v866_v38  ;;  %v319_v38 = vld [vmem:[#allocation7 + $0x3c8] sm:$0xff]  ;;  %v325_v42 = vld [vmem:[#allocation7 + $0x3f8] sm:$0xff]  ;;  %v946_v49 = vpack.c.bf16 %v324_v48, %v320_v47  ;;  %v544_v9 = vld [vmem:[#allocation8 + $0x190] sm:$0xff]  ;;  %v956_v29 = vpack.c.bf16 %v515_v22, %v514_v21 }
  0x84   :  { %907 = vmatpush1.bf16.msra.mxu0 %v906_v27  ;;  %869 = vmatprep.subr.bf16.mxu1 %v868_v41  ;;  %v308_v27 = vld [vmem:[#allocation7 + $0x370] sm:$0xff]  ;;  %v944_v45 = vpack.c.bf16 %v325_v42, %v321_v40  ;;  %v513_v8 = vld [vmem:[#allocation8 + $0x98] sm:$0xff]  ;;  %v499_v28 = vld [vmem:[#allocation8 + $0x28] sm:$0xff] }
  0x85   :  { %909 = vmatprep.subr.bf16.mxu0 %v908_v32  ;;  %v938_v30 = vpack.c.bf16 %v308_v27, %v304_v26  ;;  %v310_v32 = vld [vmem:[#allocation7 + $0x380] sm:$0xff]  ;;  %v545_v10 = vld [vmem:[#allocation8 + $0x198] sm:$0xff]  ;;  %v496_v14 = vld [vmem:[#allocation8 + $0x10] sm:$0xff] }
  0x86   :  { %v878_v35 = vpack.c.bf16 %v314_v33, %v310_v32  ;;  %v497_v15 = vld [vmem:[#allocation8 + $0x18] sm:$0xff]  ;;  %v498_v27 = vld [vmem:[#allocation8 + $0x20] sm:$0xff]  ;;  %v531_v32 = vld [vmem:[#allocation8 + $0x128] sm:$0xff] }
  0x87   :  { %871 = vmatpush1.bf16.msra.mxu1 %v870_v50  ;;  %v510_v50 = vld [vmem:[#allocation8 + $0x80] sm:$0xff]  ;;  %v529_v20 = vld [vmem:[#allocation8 + $0x118] sm:$0xff]  ;;  %v516_v33 = vld [vmem:[#allocation8 + $0xb0] sm:$0xff] }
  0x88   :  { %911 = vmatpush1.bf16.msra.mxu0 %v910_v39  ;;  %873 = vmatprep.subr.bf16.mxu1 %v872_v53  ;;  %v323_v39 = vld [vmem:[#allocation7 + $0x3e8] sm:$0xff]  ;;  %v517_v34 = vld [vmem:[#allocation8 + $0xb8] sm:$0xff]  ;;  %v550_v47 = vld [vmem:[#allocation8 + $0x1c0] sm:$0xff] }
  0x89   :  { %913 = vmatprep.subr.bf16.mxu0 %v912_v44  ;;  %v880_v41 = vpack.c.bf16 %v323_v39, %v319_v38  ;;  %v322_v44 = vld [vmem:[#allocation7 + $0x3e0] sm:$0xff]  ;;  %v549_v36 = vld [vmem:[#allocation8 + $0x1b8] sm:$0xff]  ;;  %v500_v39 = vld [vmem:[#allocation8 + $0x30] sm:$0xff] }
  0x8a   :  { %v882_v46 = vpack.c.bf16 %v322_v44, %v318_v43  ;;  %v501_v40 = vld [vmem:[#allocation8 + $0x38] sm:$0xff]  ;;  %v532_v43 = vld [vmem:[#allocation8 + $0x130] sm:$0xff]  ;;  %v551_v48 = vld [vmem:[#allocation8 + $0x1c8] sm:$0xff] }
  0x8b   :  { %875 = vmatpush1.bf16.msra.mxu1 %v874_v62  ;;  %v533_v44 = vld [vmem:[#allocation8 + $0x138] sm:$0xff]  ;;  %v996_v54 = vpack.c.bf16 %v551_v48, %v550_v47  ;;  %v524_v22 = vld [vmem:[#allocation8 + $0xf0] sm:$0xff] }
  0x8c   :  { %915 = vmatpush1.bf16.msra.mxu0 %v914_v51  ;;  %877 = vmatprep.subr.bf16.mxu1 %v876_v0  ;;  %v511_v51 = vld [vmem:[#allocation8 + $0x88] sm:$0xff]  ;;  %v494_v0 = vld [vmem:[#allocation8] sm:$0xff] }
  0x8d   :  { %917 = vmatprep.subr.bf16.mxu0 %v916_v56  ;;  %v948_v53 = vpack.c.bf16 %v511_v51, %v510_v50  ;;  %v115_v56 = vlaneseq  ;;  %v994_v50 = vpack.c.bf16 %v533_v44, %v532_v43  ;;  %v502_v51 = vld [vmem:[#allocation8 + $0x40] sm:$0xff] }
  0x8f   :  { %879 = vmatpush1.bf16.msra.mxu1 %v878_v35  ;;  %v1244_v57 = vshrl.u32 %v115_v56, 7  ;;  %v548_v35 = vld [vmem:[#allocation8 + $0x1b0] sm:$0xff]  ;;  %v535_v56 = vld [vmem:[#allocation8 + $0x148] sm:$0xff] }
  0x90   :  { %919 = vmatpush1.bf16.msra.mxu0 %v918_v63  ;;  %881 = vmatprep.subr.bf16.mxu1 %v880_v41  ;;  %v960_v41 = vpack.c.bf16 %v517_v34, %v516_v33  ;;  %v992_v42 = vpack.c.bf16 %v549_v36, %v548_v35  ;;  %v326_v35 = vld [vmem:[%s1283_s4] sm:$0xf] }
  0x91   :  { %921 = vmatprep.subr.bf16.mxu0 %v920_v1  ;;  %v117_v58 = vsub.s32 0, %v1244_v57  ;;  %v121_v60 = vsub.s32 1, %v1244_v57  ;;  %v495_v1 = vld [vmem:[#allocation8 + $0x8] sm:$0xff]  ;;  %v338_v34 = vsub.s32 2, %v1244_v57  ;;  %v342_v36 = vsub.s32 3, %v1244_v57 }
  0x93   :  { %883 = vmatpush1.bf16.msra.mxu1 %v882_v46  ;;  %v118_v61 = vrot.slane %v113_v59, %v117_v58  ;;  %v122_v62 = vrot.slane %v113_v59, %v121_v60  ;;  %v519_v46 = vld [vmem:[#allocation8 + $0xc8] sm:$0xff]  ;;  %v520_v59 = vld [vmem:[#allocation8 + $0xd0] sm:$0xff] }
  0x94   :  { %923 = vmatpush1.bf16.msra.mxu0 %v922_v6  ;;  %949 = vmatprep.subr.bf16.mxu1 %v948_v53  ;;  %v512_v6 = vld [vmem:[#allocation8 + $0x90] sm:$0xff] }
  0x95   :  { %925 = vmatprep.subr.bf16.mxu0 %v924_v7  ;;  %v952_v17 = vpack.c.bf16 %v513_v8, %v512_v6  ;;  %v536_v6 = vld [vmem:[#allocation8 + $0x150] sm:$0xff]  ;;  %v522_v8 = vld [vmem:[#allocation8 + $0xe0] sm:$0xff] }
  0x98   :  { %927 = vmatpush1.bf16.msra.mxu0 %v926_v12  ;;  %v950_v12 = vpack.c.bf16 %v495_v1, %v494_v0  ;;  %v966_v0 = vpack.c.bf16 %v503_v52, %v502_v51 }
  0x99   :  { %929 = vmatprep.subr.bf16.mxu0 %v928_v13  ;;  %v982_v13 = vpack.c.bf16 %v527_v5, %v526_v4 }
  0x9c   :  { %931 = vmatpush1.bf16.msra.mxu0 %v930_v18  ;;  %v984_v18 = vpack.c.bf16 %v545_v10, %v544_v9  ;;  %v523_v9 = vld [vmem:[#allocation8 + $0xe8] sm:$0xff]  ;;  %v554_v10 = vld [vmem:[#allocation8 + $0x1e0] sm:$0xff] }
  0x9d   :  { %933 = vmatprep.subr.bf16.mxu0 %v932_v19  ;;  %v528_v19 = vld [vmem:[#allocation8 + $0x110] sm:$0xff] }
  0x9e   :  { %v986_v26 = vpack.c.bf16 %v529_v20, %v528_v19  ;;  %v539_v20 = vld [vmem:[#allocation8 + $0x168] sm:$0xff] }
  0xa0   :  { %935 = vmatpush1.bf16.msra.mxu0 %v934_v24  ;;  %v547_v24 = vld [vmem:[#allocation8 + $0x1a8] sm:$0xff] }
  0xa1   :  { %937 = vmatprep.subr.bf16.mxu0 %v936_v25  ;;  %v954_v25 = vpack.c.bf16 %v497_v15, %v496_v14  ;;  %v972_v14 = vpack.c.bf16 %v523_v9, %v522_v8 }
  0xa4   :  { %939 = vmatpush1.bf16.msra.mxu0 %v938_v30  ;;  %v988_v30 = vpack.c.bf16 %v547_v24, %v546_v23  ;;  %v525_v23 = vld [vmem:[#allocation8 + $0xf8] sm:$0xff]  ;;  %v556_v24 = vld [vmem:[#allocation8 + $0x1f0] sm:$0xff] }
  0xa5   :  { %941 = vmatprep.subr.bf16.mxu0 %v940_v31  ;;  %v530_v31 = vld [vmem:[#allocation8 + $0x120] sm:$0xff] }
  0xa6   :  { %v990_v38 = vpack.c.bf16 %v531_v32, %v530_v31  ;;  %v540_v31 = vld [vmem:[#allocation8 + $0x170] sm:$0xff]  ;;  %v541_v32 = vld [vmem:[#allocation8 + $0x178] sm:$0xff] }
  0xa7   :  { %v1010_v33 = vpack.c.bf16 %v541_v32, %v540_v31 }
  0xa8   :  { %943 = vmatpush1.bf16.msra.mxu0 %v942_v37  ;;  %v958_v37 = vpack.c.bf16 %v499_v28, %v498_v27  ;;  %v508_v27 = vld [vmem:[#allocation8 + $0x70] sm:$0xff]  ;;  %v509_v28 = vld [vmem:[#allocation8 + $0x78] sm:$0xff] }
  0xa9   :  { %945 = vmatprep.subr.bf16.mxu0 %v944_v45  ;;  %v518_v45 = vld [vmem:[#allocation8 + $0xc0] sm:$0xff] }
  0xaa   :  { %v964_v53 = vpack.c.bf16 %v519_v46, %v518_v45 }
  0xac   :  { %947 = vmatpush1.bf16.msra.mxu0 %v946_v49  ;;  %v962_v49 = vpack.c.bf16 %v501_v40, %v500_v39  ;;  %v335_v39 = vrot.slane %v326_v35, %v121_v60  ;;  %v343_v40 = vrot.slane %v326_v35, %v342_v36  ;;  %v558_v60 = vld [vmem:[%s1285_s6] sm:$0x1] }
  0xad   :  { %981 = vmatprep.subr.bf16.mxu0 %v980_v55  ;;  %v534_v55 = vld [vmem:[#allocation8 + $0x140] sm:$0xff] }
  0xae   :  { %v998_v1 = vpack.c.bf16 %v535_v56, %v534_v55 }
 0x142   :  { %v191_v63 = vpop.f32.mrb[0].mxu0 }
 0x143   :  { %v192_v2 = vadd.f32 %v191_v63, %v118_v61  ;;  %v193_v3 = vpop.f32.mrb[1].mxu0  ;;  %v521_v61 = vld [vmem:[#allocation8 + $0xd8] sm:$0xff] }
 0x144   :  { %v194_v7 = vadd.f32 %v193_v3, %v122_v62  ;;  %v552_v62 = vld [vmem:[#allocation8 + $0x1d0] sm:$0xff]  ;;  %v553_v63 = vld [vmem:[#allocation8 + $0x1d8] sm:$0xff]  ;;  %v968_v4 = vpack.c.bf16 %v521_v61, %v520_v59 }
 0x145   :  { %v196_v16 = vmax.f32 %v192_v2, 0.0  ;;  %v504_v2 = vld [vmem:[#allocation8 + $0x50] sm:$0xff]  ;;  %v505_v3 = vld [vmem:[#allocation8 + $0x58] sm:$0xff]  ;;  %v1000_v5 = vpack.c.bf16 %v553_v63, %v552_v62 }
 0x146   :  { %v197_v11 = vmax.f32 %v194_v7, 0.0  ;;  %v537_v7 = vld [vmem:[#allocation8 + $0x158] sm:$0xff] }
 0x148   :  { %412 = vmatprep.mubr.f32.mxu1 %v197_v11  ;;  %483 = vmatprep.mubr.f32.mxu0 %v197_v11  ;;  %v555_v11 = vld [vmem:[#allocation8 + $0x1e8] sm:$0xff] }
 0x149   :  { %413 = vmatmul.mubr.f32.vlgmr.msra.gmra.mrb[0].mxu1 %v196_v16  ;;  %484 = vmatmul.mubr.f32.vlgmr.msra.gmra.mrb[2].mxu0 %v196_v16  ;;  %v1004_v15 = vpack.c.bf16 %v555_v11, %v554_v10  ;;  %v506_v16 = vld [vmem:[#allocation8 + $0x60] sm:$0xff] }
 0x14a   :  { %951 = vmatpush3.bf16.msra.mxu1 %v950_v12  ;;  %983 = vmatpush3.bf16.msra.mxu0 %v982_v13  ;;  %v970_v12 = vpack.c.bf16 %v505_v3, %v504_v2  ;;  %v1002_v13 = vpack.c.bf16 %v537_v7, %v536_v6 }
 0x14b   :  { %953 = vmatprep.subr.bf16.mxu1 %v952_v17  ;;  %985 = vmatprep.subr.bf16.mxu0 %v984_v18  ;;  %v507_v17 = vld [vmem:[#allocation8 + $0x68] sm:$0xff]  ;;  %v538_v18 = vld [vmem:[#allocation8 + $0x160] sm:$0xff] }
 0x14c   :  { %v974_v19 = vpack.c.bf16 %v507_v17, %v506_v16  ;;  %v1006_v21 = vpack.c.bf16 %v539_v20, %v538_v18 }
 0x14e   :  { %955 = vmatpush3.bf16.msra.mxu1 %v954_v25  ;;  %987 = vmatpush3.bf16.msra.mxu0 %v986_v26  ;;  %v976_v25 = vpack.c.bf16 %v525_v23, %v524_v22  ;;  %v557_v26 = vld [vmem:[#allocation8 + $0x1f8] sm:$0xff] }
 0x14f   :  { %957 = vmatprep.subr.bf16.mxu1 %v956_v29  ;;  %989 = vmatprep.subr.bf16.mxu0 %v988_v30  ;;  %v1008_v29 = vpack.c.bf16 %v557_v26, %v556_v24  ;;  %v978_v30 = vpack.c.bf16 %v509_v28, %v508_v27 }
 0x152   :  { %959 = vmatpush3.bf16.msra.mxu1 %v958_v37  ;;  %991 = vmatpush3.bf16.msra.mxu0 %v990_v38  ;;  %v331_v37 = vrot.slane %v326_v35, %v117_v58  ;;  %v339_v38 = vrot.slane %v326_v35, %v338_v34 }
 0x153   :  { %961 = vmatprep.subr.bf16.mxu1 %v960_v41  ;;  %993 = vmatprep.subr.bf16.mxu0 %v992_v42 }
 0x156   :  { %963 = vmatpush3.bf16.msra.mxu1 %v962_v49  ;;  %995 = vmatpush3.bf16.msra.mxu0 %v994_v50 }
 0x157   :  { %965 = vmatprep.subr.bf16.mxu1 %v964_v53  ;;  %997 = vmatprep.subr.bf16.mxu0 %v996_v54 }
 0x15a   :  { %967 = vmatpush3.bf16.msra.mxu1 %v966_v0  ;;  %999 = vmatpush3.bf16.msra.mxu0 %v998_v1 }
 0x15b   :  { %969 = vmatprep.subr.bf16.mxu1 %v968_v4  ;;  %1001 = vmatprep.subr.bf16.mxu0 %v1000_v5 }
 0x15e   :  { %971 = vmatpush3.bf16.msra.mxu1 %v970_v12  ;;  %1003 = vmatpush3.bf16.msra.mxu0 %v1002_v13 }
 0x15f   :  { %973 = vmatprep.subr.bf16.mxu1 %v972_v14  ;;  %1005 = vmatprep.subr.bf16.mxu0 %v1004_v15 }
 0x162   :  { %975 = vmatpush3.bf16.msra.mxu1 %v974_v19  ;;  %1007 = vmatpush3.bf16.msra.mxu0 %v1006_v21 }
 0x163   :  { %977 = vmatprep.subr.bf16.mxu1 %v976_v25  ;;  %1009 = vmatprep.subr.bf16.mxu0 %v1008_v29 }
 0x166   :  { %979 = vmatpush3.bf16.msra.mxu1 %v978_v30  ;;  %1011 = vmatpush3.bf16.msra.mxu0 %v1010_v33 }
 0x21c   :  { %v414_v41 = vpop.f32.mrb[0].mxu1  ;;  %v485_v42 = vpop.f32.mrb[2].mxu0 }
 0x21d   :  { %v415_v43 = vadd.f32 %v414_v41, %v331_v37  ;;  %v486_v44 = vadd.f32 %v485_v42, %v339_v38  ;;  %v416_v45 = vpop.f32.mrb[1].mxu1  ;;  %v487_v46 = vpop.f32.mrb[3].mxu0 }
 0x21e   :  { %v417_v47 = vadd.f32 %v416_v45, %v335_v39  ;;  %v488_v48 = vadd.f32 %v487_v46, %v343_v40 }
 0x21f   :  { %v490_v51 = vmax.f32 %v415_v43, 0.0  ;;  %v492_v52 = vmax.f32 %v486_v44, 0.0 }
 0x220   :  { %v491_v49 = vmax.f32 %v417_v47, 0.0  ;;  %v493_v50 = vmax.f32 %v488_v48, 0.0 }
 0x222   :  { %623 = vmatprep.mubr.f32.mxu1 %v491_v49  ;;  %693 = vmatprep.mubr.f32.mxu0 %v493_v50 }
 0x223   :  { %624 = vmatmul.mubr.f32.vlgmr.msra.gmra.mrb[2].mxu1 %v490_v51  ;;  %694 = vmatmul.mubr.f32.vlgmr.msra.gmra.mrb[4].mxu0 %v492_v52 }
 0x2f6   :  { %v750_v58 = vpop.f32.mrb[2].mxu1  ;;  %v785_v57 = vpop.f32.mrb[4].mxu0 }
 0x2f7   :  { %v751_v53 = vpop.f32.mrb[3].mxu1  ;;  %v786_v54 = vpop.f32.mrb[5].mxu0 }
 0x2f8   :  { %v752_v55 = vadd.f32 %v751_v53, %v750_v58  ;;  %v787_v56 = vadd.f32 %v786_v54, %v785_v57 }
 0x2fa   :  { %v626_v59 = vadd.f32 %v752_v55, %v558_v60 }
 0x2fc   :  { %v696_v61 = vadd.f32 %v787_v56, %v626_v59 }
 0x2fe   :  { %1024 = vtanh.f32 %v696_v61 }
 0x308   :  { %v1025_v62 = vpop.eup %1024 }
 0x309   :  { %700 = vst [vmem:[#allocation10] sm:$0x1] %v1025_v62 }
 0x30a   :  { %1125 = shalt.err (!%p1122_p8)
}
 0x30b   :  { %s1126_s0 = scalar_lea.hbm %s1286_s7, 16 }
 0x30c   :  { %p1127_p9 = scmp.ne.s32.totalorder %s1286_s7, %s1126_s0  ;;  %p1130_p10 = scmp.lt.u32.totalorder %s1126_s0, %s1286_s7 }
 0x30e   :  { %p1132_p11 = pnand %p1130_p10, %p1127_p9 }
 0x310   :  { %1135 = shalt.err (!%p1132_p11)
}
 0x311   :  { %710 = dma.vmem_to_hbm [thread:$0]  %s708_s10, 16, %s1286_s7, [#allocation4]  }
 0x312   :  { %1142 = dma.done.wait [#allocation4], 16  }
 0x313   :  { %1143 = vsyncadd [#allocation4], 4294967280 }
 0x314   :  { %714 = vsyncpa [#allocation3], 1 }
 0x315   :  { %715 = vsyncpa [#allocation6], 1 }
 0x316   :  { %716 = vsyncpa [#allocation9], 1 }
 0x317   :  { %717 = vsyncpa [#allocation4], 1 }

</bundles_post_ra>
